<compile_context>
chip_gen: v7x
topology: tpu7x:2x2x1
jax: 0.10.0
libtpu: 0.0.40
codegen_flags: <defaults>
</compile_context>

<pallas_src>
import functools
import math

import jax
import jax.numpy as jnp
from jax.experimental import pallas as pl
from jax.experimental.pallas import tpu as pltpu


def _metrics_kernel(preds_ref, targets_ref, out_ref, *,
                    logit_threshold, hamming, num_rows, tile_rows):
    """One grid step: count correct predictions inside this (tile_rows, C) block."""
    i = pl.program_id(0)

    # sigmoid(x) < t  <=>  x < logit(t) for t in (0,1); NaN logits give lt=False
    # -> binarize to 1, matching torch.where(sigmoid(x) < t, 0, 1).
    x = preds_ref[...]
    if x.dtype != jnp.float32:
        x = x.astype(jnp.float32)          # cheap VPU cast; HBM traffic stays narrow
    lt = x < logit_threshold               # (tile_rows, C) bool

    t = targets_ref[...]
    if jnp.issubdtype(t.dtype, jnp.floating):
        cmp_dtype, tv = t.dtype, t
    else:
        cmp_dtype, tv = jnp.int32, t.astype(jnp.int32)
    # Faithful to the reference: binarized preds compared against raw targets,
    # so non-{0,1} targets never count as correct.
    pred_bin = jnp.where(lt, jnp.zeros((), cmp_dtype), jnp.ones((), cmp_dtype))
    eq = pred_bin == tv                    # (tile_rows, C) bool

    def _count(mask_tail):
        ok = eq if hamming else jnp.all(eq, axis=1, keepdims=True)
        if mask_tail:
            row_ids = i * tile_rows + jax.lax.broadcasted_iota(
                jnp.int32, (tile_rows, 1), 0)
            ok = jnp.logical_and(ok, row_ids < num_rows)
        return jnp.sum(ok, dtype=jnp.int32)

    def _emit(c):
        out_ref[...] = jnp.broadcast_to(c, out_ref.shape)

    if num_rows % tile_rows == 0:
        _emit(_count(False))               # no padded tail: mask-free everywhere
    else:
        last = pl.num_programs(0) - 1

        @pl.when(i != last)
        def _():
            _emit(_count(False))

        @pl.when(i == last)
        def _():
            _emit(_count(True))


@functools.partial(jax.jit, static_argnums=(2, 3, 4))
def _count_correct_jit(preds, targets, threshold, criteria, tile_rows):
    if preds.ndim != 2 or preds.shape != targets.shape:
        raise ValueError("preds/targets must share a 2D (batch, labels) shape")
    R, C = preds.shape
    hamming = (criteria == 'hamming')

    # Hamming only needs an element count: re-layout small / ragged label dims
    # into lane-dense (rows, 128*k) so VMEM blocks and DMAs use full lanes.
    if hamming and (C % 128 != 0) and ((R * C) % 128 == 0):
        new_c = 128
        for cand in (512, 256, 128):
            if (R * C) % cand == 0:
                new_c = cand
                break
        preds = preds.reshape((R * C) // new_c, new_c)
        targets = targets.reshape((R * C) // new_c, new_c)
        R, C = preds.shape

    p_item = preds.dtype.itemsize
    t_item = targets.dtype.itemsize
    lane_c = ((C + 127) // 128) * 128      # lane-padded width actually held in VMEM

    if tile_rows is None:
        # Byte-budget tiling: ~8 MiB of inputs per grid step so the ~0.35us per-step
        # overhead amortizes, while double-buffered blocks stay inside v7x's 64 MiB VMEM.
        budget = 8 << 20
        rows = budget // max(1, lane_c * (p_item + t_item))
        rows = max(32, (rows // 32) * 32)  # multiple of 32 covers f32/bf16/int8 tiling
        # TODO(synk): tile the label axis too if a single 32-row block exceeds the budget.
        tile_rows = rows if rows < R else R
    else:
        tile_rows = min(int(tile_rows), R)
    if tile_rows < R:
        tile_rows = max(8, (tile_rows // 8) * 8)

    num_tiles = pl.cdiv(R, tile_rows)

    if threshold <= 0.0:
        logit_t = float("-inf")            # sigmoid(x) < t never true -> pred 1
    elif threshold >= 1.0:
        logit_t = float("inf")             # sigmoid(x) < t (almost) always -> pred 0
    else:
        logit_t = float(math.log(threshold / (1.0 - threshold)))

    kernel = functools.partial(
        _metrics_kernel,
        logit_threshold=logit_t,
        hamming=hamming,
        num_rows=R,
        tile_rows=tile_rows,
    )

    step_bytes = tile_rows * lane_c * (p_item + t_item)
    vmem_limit = int(min(max(3 * step_bytes + (4 << 20), 16 << 20), 64 << 20))

    # One int32 partial per grid step, lane-broadcast into a legal (1,1,128) VMEM
    # block. No carried accumulator -> the grid axis can be "parallel" and shard
    # across both v7x TensorCores (harmless on single-TC v5e/v6e).
    partials = pl.pallas_call(
        kernel,
        out_shape=jax.ShapeDtypeStruct((num_tiles, 1, 128), jnp.int32),
        grid=(num_tiles,),
        in_specs=[
            pl.BlockSpec((tile_rows, C), lambda i: (i, 0)),
            pl.BlockSpec((tile_rows, C), lambda i: (i, 0)),
        ],
        out_specs=pl.BlockSpec((1, 1, 128), lambda i: (i, 0, 0)),
        compiler_params=pltpu.CompilerParams(
            dimension_semantics=("parallel",),
            vmem_limit_bytes=vmem_limit,
        ),
    )(preds, targets)
    return jnp.sum(partials[:, 0, 0])


def _count_correct(preds, targets, threshold, criteria, tile_rows=None):
    """Returns num_correct as a device int32 scalar."""
    return _count_correct_jit(preds, targets, float(threshold), criteria, tile_rows)


class MultiLabelAccuracyMetrics:
    """JAX/Pallas port of the PyTorch MultiLabelAccuracyMetrics module."""

    def __init__(self, **kwargs):
        self.criteria = kwargs['criteria']
        self.threshold = kwargs['threshold']
        self.num_correct = 0
        self.num_total = 0

    def reset(self):
        self.num_correct = 0
        self.num_total = 0

    def update(self, preds, targets):
        num_correct = _count_correct(preds, targets, self.threshold, self.criteria)
        if self.criteria == 'hamming':
            num_total = int(targets.size)
        else:
            num_total = int(targets.shape[0])
        # Accumulate device-side; no host sync needed until compute() (or the return).
        self.num_correct = self.num_correct + num_correct
        self.num_total = self.num_total + num_total
        # TODO(synk): this per-update float return forces a device->host sync; in hot
        # training loops skip it and read compute() at the end instead.
        return float(num_correct) / num_total

    def compute(self):
        return float(self.num_correct) / float(self.num_total)

    def __call__(self, preds, targets):
        return self.update(preds=preds, targets=targets)


if __name__ == "__main__":
    key = jax.random.PRNGKey(0)
    k1, k2, k3, k4, k5, k6 = jax.random.split(key, 6)

    def reference_counts(preds, targets, threshold):
        p = jax.nn.sigmoid(preds.astype(jnp.float32))
        pred_bin = jnp.where(p < threshold, 0, 1)
        eq = pred_bin == targets.astype(jnp.int32)
        return int(jnp.sum(eq)), int(jnp.sum(jnp.all(eq, axis=1)))

    # ---- test 1: small aligned shape (exercises the lane-dense hamming path) ----
    B, L = 8, 16
    preds = jax.random.normal(k1, (B, L), dtype=jnp.float32)            # logits
    targets = jax.random.bernoulli(k2, 0.5, (B, L)).astype(jnp.int32)

    ham = _count_correct(preds, targets, 0.5, 'hamming')
    exa = _count_correct(preds, targets, 0.5, 'exact')
    jax.block_until_ready((ham, exa))
    ref_ham, ref_exa = reference_counts(preds, targets, 0.5)
    assert int(ham) == ref_ham, (int(ham), ref_ham)
    assert int(exa) == ref_exa, (int(exa), ref_exa)

    # ---- test 2: ragged batch, forced multi-tile grid (padded-tail mask) --------
    B2, L2, thr2 = 13, 16, 0.3
    preds2 = jax.random.normal(k3, (B2, L2), dtype=jnp.float32)
    targets2 = jax.random.bernoulli(k4, 0.5, (B2, L2)).astype(jnp.int32)

    ham2 = _count_correct(preds2, targets2, thr2, 'hamming', tile_rows=8)
    exa2 = _count_correct(preds2, targets2, thr2, 'exact', tile_rows=8)
    jax.block_until_ready((ham2, exa2))
    ref_ham2, ref_exa2 = reference_counts(preds2, targets2, thr2)
    assert int(ham2) == ref_ham2, (int(ham2), ref_ham2)
    assert int(exa2) == ref_exa2, (int(exa2), ref_exa2)

    # ---- test 3: narrow dtypes (bf16 logits, int8 targets), multi-tile grid -----
    B3, L3, thr3 = 80, 48, 0.45
    preds3 = jax.random.normal(k5, (B3, L3), dtype=jnp.bfloat16)
    targets3 = jax.random.bernoulli(k6, 0.5, (B3, L3)).astype(jnp.int8)

    ham3 = _count_correct(preds3, targets3, thr3, 'hamming')
    exa3 = _count_correct(preds3, targets3, thr3, 'exact', tile_rows=32)
    jax.block_until_ready((ham3, exa3))
    ref_ham3, ref_exa3 = reference_counts(preds3, targets3, thr3)
    assert int(ham3) == ref_ham3, (int(ham3), ref_ham3)
    assert int(exa3) == ref_exa3, (int(exa3), ref_exa3)

    # ---- module wrapper, both criteria, device-side accumulation ----------------
    m_ham = MultiLabelAccuracyMetrics(criteria='hamming', threshold=0.5)
    acc_ham = m_ham(preds, targets)
    assert abs(acc_ham - ref_ham / (B * L)) < 1e-6

    m_exa = MultiLabelAccuracyMetrics(criteria='exact', threshold=0.5)
    acc_exa = m_exa(preds, targets)
    assert abs(acc_exa - ref_exa / B) < 1e-6
    m_exa(preds2, targets2)   # second update at the module's threshold (0.5)
    _, ref_exa2_05 = reference_counts(preds2, targets2, 0.5)
    assert abs(m_exa.compute() - (ref_exa + ref_exa2_05) / (B + B2)) < 1e-6

    print("KERNEL_OK")
</pallas_src>

<mosaic_0001>
module attributes {stable_mosaic.version = 11 : i64} {
  func.func @_metrics_kernel(%arg0: i32, %arg1: memref<1x128xf32, #tpu.memory_space<vmem>>, %arg2: memref<1x128xi32, #tpu.memory_space<vmem>>, %arg3: memref<1x1x128xi32, #tpu.memory_space<vmem>>) attributes {dimension_semantics = [#tpu.dimension_semantics<parallel>], iteration_bounds = array<i64: 1>, scalar_prefetch = 0 : i64, scratch_operands = 0 : i64, tpu.core_type = #tpu.core_type<tc>, window_params = [{transform_indices = @transform_0, window_bounds = array<i64: 1, 128>}, {transform_indices = @transform_1, window_bounds = array<i64: 1, 128>}, {transform_indices = @transform_2, window_bounds = array<i64: 1, 1, 128>}]} {
    %c0 = arith.constant 0 : index
    %c0_0 = arith.constant 0 : index
    %0 = vector.load %arg1[%c0, %c0_0] : memref<1x128xf32, #tpu.memory_space<vmem>>, vector<1x128xf32>
    %cst = arith.constant 0.000000e+00 : f32
    %1 = vector.broadcast %cst : f32 to vector<1x128xf32>
    %2 = arith.cmpf olt, %0, %1 : vector<1x128xf32>
    %c0_1 = arith.constant 0 : index
    %c0_2 = arith.constant 0 : index
    %3 = vector.load %arg2[%c0_1, %c0_2] : memref<1x128xi32, #tpu.memory_space<vmem>>, vector<1x128xi32>
    %c0_i32 = arith.constant 0 : i32
    %c1_i32 = arith.constant 1 : i32
    %4 = vector.broadcast %c0_i32 : i32 to vector<1x128xi32>
    %5 = vector.broadcast %c1_i32 : i32 to vector<1x128xi32>
    %6 = arith.select %2, %4, %5 : vector<1x128xi1>, vector<1x128xi32>
    %7 = arith.cmpi eq, %6, %3 : vector<1x128xi32>
    %8 = arith.extui %7 : vector<1x128xi1> to vector<1x128xi32>
    %9 = vector.shape_cast %8 : vector<1x128xi32> to vector<1x1x128xi32>
    %cst_3 = arith.constant dense<0> : vector<1xi32>
    %10 = vector.multi_reduction <add>, %9, %cst_3 [1, 2] : vector<1x1x128xi32> to vector<1xi32>
    %11 = vector.shape_cast %10 : vector<1xi32> to vector<1x1x1xi32>
    %12 = vector.extract %11[0, 0, 0] : i32 from vector<1x1x1xi32>
    %13 = vector.broadcast %12 : i32 to vector<1x1x128xi32>
    %c0_4 = arith.constant 0 : index
    %c0_5 = arith.constant 0 : index
    %c0_6 = arith.constant 0 : index
    %14 = vector.load %arg3[%c0_4, %c0_5, %c0_6] : memref<1x1x128xi32, #tpu.memory_space<vmem>>, vector<1x1x128xi32>
    tpu.vector_store %arg3[%c0_4, %c0_5, %c0_6], %13 {strides = array<i32>} : memref<1x1x128xi32, #tpu.memory_space<vmem>>, vector<1x1x128xi32>,
    return
  }
  func.func @transform_0(%arg0: i32) -> (i32, i32) {
    %c0_i32 = arith.constant 0 : i32
    %c0_i32_0 = arith.constant 0 : i32
    return %arg0, %c0_i32 : i32, i32
  }
  func.func @transform_1(%arg0: i32) -> (i32, i32) {
    %c0_i32 = arith.constant 0 : i32
    %c0_i32_0 = arith.constant 0 : i32
    return %arg0, %c0_i32 : i32, i32
  }
  func.func @transform_2(%arg0: i32) -> (i32, i32, i32) {
    %c0_i32 = arith.constant 0 : i32
    %c0_i32_0 = arith.constant 0 : i32
    %c0_i32_1 = arith.constant 0 : i32
    return %arg0, %c0_i32, %c0_i32_0 : i32, i32, i32
  }
}

</mosaic_0001>

<bundles_post_ra>
// kernel: _count_correct_jit.1
= control target key start
LH: loop header
LB: loop body
LE: loop exit
PB: predicated region body
PF: predicated region fallthrough
CT: control target
= control target key end

     0   :  { %s120_s0 = inlined_call_operand.vmem [shape: f32[1,128], index: 0, kind: input, shape index: {}]   ;;  %s121_s1 = inlined_call_operand.vmem [shape: s32[1,128], index: 1, kind: input, shape index: {}]   ;;  %s122_s2 = inlined_call_operand.hbm [shape: s32[1,1,128], index: 2, kind: output, shape index: {}]  }
   0x1   :  { %v12_v0 = vld [vmem:[%s120_s0] sm:$0x1] }
   0x2   :  { %v14_v1 = vld [vmem:[%s121_s1] sm:$0x1]  ;;  %vm13_vm0 = vcmp.lt.f32.partialorder %v12_v0, 0.0 }
   0x3   :  { %7 = vsyncpa [#allocation3], 0  ;;  %v84_v2 = vmov 1   ;;  %vm18_vm1 = vcmask 1040384   ;;  %v85_v4 = vmov 0   ;;  %s86_s0 = smov [#allocation2]  }
   0x4   :  { %v15_v3 = vsel %vm13_vm0, 0, %v84_v2  ;;  %s47_s1 = sshll.u32 %s86_s0, 4  ;;  %s48_s1 = int_to_ptr.vmem [resolvable:$true] %s47_s1 }
   0x5   :  { %vm16_vm2 = vcmp.eq.s32.totalorder %v15_v3, %v14_v1  ;;  %s60_s14 = scalar_lea.vmem %s48_s1, 16  ;;  %s64_s15 = scalar_lea.vmem %s48_s1, 32 }
   0x6   :  { %v17_v5 = vsel %vm16_vm2, 1, %v85_v4  ;;  %p61_p0 = scmp.ne.s32.totalorder %s48_s1, %s60_s14  ;;  %p65_p1 = scmp.lt.s32.totalorder %s48_s1, %s48_s1 }
   0x7   :  { %v19_v6 = vsel %vm18_vm1, %v17_v5, 0  ;;  %p66_p2 = scmp.lt.s32.totalorder %s64_s15, %s60_s14 }
   0x8   :  { %v21_v7 = vshrl.u32 %v19_v6, 16  ;;  %v20_v8 = vand.u32 65535, %v19_v6 }
   0x9   :  { %p67_p3 = por %p66_p2, %p65_p1 }
   0xa   :  { %v23_v9 = vcvt.s32.f32 %v21_v7  ;;  %v22_v10 = vcvt.s32.f32 %v20_v8 }
   0xb   :  { %p68_p4 = pnand %p67_p3, %p61_p0 }
   0xc   :  { %26 = vadd.xlane.f32.xlu0 %v23_v9 }
  0x10   :  { %24 = vadd.xlane.f32.xlu0 %v22_v10 }
  0x99   :  { %v27_v11 = vpop.xlane.xlu0 %26 }
  0x9a   :  { %v29_v12 = vcvt.f32.s32 %v27_v11 }
  0x9c   :  { %v30_v14 = vshll.u32 %v29_v12, 16 }
  0x9d   :  { %v25_v13 = vpop.xlane.xlu0 %24 }
  0x9e   :  { %v28_v15 = vcvt.f32.s32 %v25_v13 }
  0xa0   :  { %v31_v16 = vadd.s32 %v30_v14, %v28_v15 }
  0xa2   :  { %v32_v17 = vrot.slane %v31_v16, 4 }
  0xa4   :  { %v33_v18 = vadd.s32 %v32_v17, %v31_v16 }
  0xa6   :  { %v34_v19 = vrot.slane %v33_v18, 2 }
  0xa8   :  { %v35_v20 = vadd.s32 %v34_v19, %v33_v18 }
  0xaa   :  { %v36_v21 = vrot.slane %v35_v20, 1 }
  0xac   :  { %v37_v22 = vadd.s32 %v36_v21, %v35_v20 }
  0xae   :  { %55 = vpush %v37_v22 }
  0xdf   :  { %s56_s13 = spop %55 }
  0xe0   :  { %v39_v23 = vstv %s56_s13 }
  0xe1   :  { %40 = vst [vmem:[#allocation2] sm:$0x1] %v39_v23 }
  0xe2   :  { %71 = shalt.err (!%p68_p4)
}
  0xe3   :  { %s72_s18 = scalar_lea.hbm %s122_s2, 16 }
  0xe4   :  { %p73_p5 = scmp.ne.s32.totalorder %s122_s2, %s72_s18  ;;  %p76_p6 = scmp.lt.u32.totalorder %s72_s18, %s122_s2 }
  0xe6   :  { %p78_p7 = pnand %p76_p6, %p73_p5 }
  0xe8   :  { %81 = shalt.err (!%p78_p7)
}
  0xe9   :  { %50 = dma.vmem_to_hbm [thread:$0]  %s48_s1, 16, %s122_s2, [#allocation3]  }
  0xea   :  { %82 = dma.done.wait [#allocation3], 16  }
  0xeb   :  { %83 = vsyncadd [#allocation3], 4294967280 }
  0xec   :  { %54 = vsyncpa [#allocation3], 1 }

</bundles_post_ra>
